<compile_context>
chip_gen: v7x
topology: tpu7x:2x2x1
jax: 0.10.0
libtpu: 0.0.40
codegen_flags: <defaults>
</compile_context>

<pallas_src>
import functools
import math

import jax
import jax.numpy as jnp
from jax.experimental import pallas as pl
from jax.experimental.pallas import tpu as pltpu


# ---------------------------- small helpers ----------------------------

def _row_block(m, max_rows=256):
    """Largest row block <= max_rows that evenly divides m (multiple of 8 when possible)."""
    if m <= max_rows:
        return m
    bm = max_rows - (max_rows % 8)
    while bm >= 8 and m % bm != 0:
        bm -= 8
    if bm >= 8 and m % bm == 0:
        return bm
    # TODO(synk): pad M to a multiple of 8 upstream instead of one whole-array block.
    return m


def _lane_block(n, max_lanes=512):
    """Largest lane block <= max_lanes that divides n and is a multiple of 128 when possible."""
    if n <= max_lanes:
        return n
    bn = max_lanes - (max_lanes % 128)
    while bn >= 128 and n % bn != 0:
        bn -= 128
    return bn if (bn >= 128 and n % bn == 0) else n


def _layernorm(x, g, b, eps):
    mean = jnp.mean(x, axis=-1, keepdims=True)
    var = jnp.mean(jnp.square(x - mean), axis=-1, keepdims=True)
    return (x - mean) * jax.lax.rsqrt(var + eps) * g + b


def _cparams(semantics, blocks, extra_bytes=0):
    """CompilerParams with a vmem limit sized from resident (double-buffered) blocks."""
    resident = sum(int(math.prod(s)) * jnp.dtype(d).itemsize for s, d in blocks)
    limit = int(min(64 << 20, max(32 << 20, 2 * resident + extra_bytes + (1 << 20))))
    return pltpu.CompilerParams(dimension_semantics=semantics, vmem_limit_bytes=limit)


# ---------------------------- Pallas kernels ----------------------------

def _embed_ln_kernel(eps, x_ref, pos_ref, g_ref, b_ref, o_ref):
    # x_ref: (1, bs, H) word+type embedding sum (bf16); pos_ref: (bs, H) (bf16)
    x = x_ref[0].astype(jnp.float32) + pos_ref[...].astype(jnp.float32)
    o_ref[0] = _layernorm(x, g_ref[...], b_ref[...], eps).astype(o_ref.dtype)


def _matmul_bias_kernel(x_ref, w_ref, b_ref, o_ref):
    # Fused QKV projection: y = x @ w_qkv + b_qkv (bf16 operands, f32 accumulate).
    y = jnp.dot(x_ref[...], w_ref[...], preferred_element_type=jnp.float32) + b_ref[...]
    o_ref[...] = y.astype(o_ref.dtype)


def _attention_kernel(scale, q_ref, k_ref, v_ref, m_ref, o_ref):
    # One (batch, head) pair per grid step; blocks are (1, 1, S, d).
    q = q_ref[0, 0]                                   # (S, d) bf16
    k = k_ref[0, 0]
    v = v_ref[0, 0]
    bias = (1.0 - m_ref[0].astype(jnp.float32)) * (-1e9)   # (1, S), f32
    # contract last dims directly -> no explicit k.T materialization
    s = jax.lax.dot_general(q, k, (((1,), (1,)), ((), ())),
                            preferred_element_type=jnp.float32) * scale + bias
    m = jnp.max(s, axis=-1, keepdims=True)
    p = jnp.exp(s - m)
    l = jnp.sum(p, axis=-1, keepdims=True)
    ctx = jnp.dot(p.astype(v.dtype), v, preferred_element_type=jnp.float32)
    # reciprocal folded into the context (EUP slot), not a VALU divide
    o_ref[0, 0] = (ctx * pl.reciprocal(l, approx=True)).astype(o_ref.dtype)
    # TODO(synk): flash-tile along KV (online softmax with m/l/acc scratch) for S>=512,
    # and process 2 heads per step so the output store is a full 128-lane vst.


def _proj_res_ln_kernel(eps, x_ref, w_ref, b_ref, res_ref, g_ref, beta_ref, o_ref):
    # attention output projection + residual add + LayerNorm, fused epilogue
    y = jnp.dot(x_ref[...], w_ref[...], preferred_element_type=jnp.float32) + b_ref[...]
    y = y + res_ref[...].astype(jnp.float32)
    o_ref[...] = _layernorm(y, g_ref[...], beta_ref[...], eps).astype(o_ref.dtype)


def _ffn_res_ln_kernel(eps, x_ref, w1_ref, b1_ref, w2_ref, b2_ref, g_ref, beta_ref,
                       o_ref, acc_ref):
    # FFN tiled along F (grid axis 1, "arbitrary"): per step compute
    # gelu(x @ w1[:, f] + b1[f]) @ w2[f, :] into an f32 accumulator; finalize with
    # bias + residual + LayerNorm. Weights never fully resident -> fits v7x VMEM.
    j = pl.program_id(1)

    @pl.when(j == 0)
    def _():
        acc_ref[...] = jnp.zeros_like(acc_ref)

    h = jnp.dot(x_ref[...], w1_ref[...], preferred_element_type=jnp.float32) + b1_ref[...]
    # TODO(synk): reference nn.GELU uses exact erf; tanh approximation kept here
    # (erf lowering on Mosaic not guaranteed) — tiny numeric drift.
    h = jax.nn.gelu(h, approximate=True)
    acc_ref[...] += jnp.dot(h.astype(w2_ref.dtype), w2_ref[...],
                            preferred_element_type=jnp.float32)

    @pl.when(j == pl.num_programs(1) - 1)
    def _():
        y = acc_ref[...] + b2_ref[...] + x_ref[...].astype(jnp.float32)
        o_ref[...] = _layernorm(y, g_ref[...], beta_ref[...], eps).astype(o_ref.dtype)


def _pool_cls_kernel(cls_ref, pw_ref, pb_ref, cw_ref, cb_ref, o_ref):
    # tanh pooler on CLS rows + final classifier, fused; output is lane-padded (128)
    p = jnp.tanh(jnp.dot(cls_ref[...], pw_ref[...],
                         preferred_element_type=jnp.float32) + pb_ref[...])
    y = jnp.dot(p.astype(cw_ref.dtype), cw_ref[...],
                preferred_element_type=jnp.float32) + cb_ref[...]
    o_ref[...] = y.astype(o_ref.dtype)


# ---------------------------- pallas_call wrappers ----------------------------

def embed_layernorm(wt_sum, pos_emb, g, b, eps=1e-12):
    B, S, H = wt_sum.shape
    bs = _row_block(S)
    blocks = [((1, bs, H), wt_sum.dtype), ((bs, H), pos_emb.dtype),
              ((1, H), jnp.float32), ((1, H), jnp.float32), ((1, bs, H), wt_sum.dtype)]
    return pl.pallas_call(
        functools.partial(_embed_ln_kernel, eps),
        out_shape=jax.ShapeDtypeStruct((B, S, H), wt_sum.dtype),
        grid=(B, S // bs),
        in_specs=[pl.BlockSpec((1, bs, H), lambda i, j: (i, j, 0)),
                  pl.BlockSpec((bs, H), lambda i, j: (j, 0)),
                  pl.BlockSpec((1, H), lambda i, j: (0, 0)),
                  pl.BlockSpec((1, H), lambda i, j: (0, 0))],
        out_specs=pl.BlockSpec((1, bs, H), lambda i, j: (i, j, 0)),
        compiler_params=_cparams(("parallel", "parallel"), blocks),
    )(wt_sum, pos_emb, g.reshape(1, H), b.reshape(1, H))


def qkv_projection(x, w, b):
    """x: [M, H] bf16, w: [H, 3H] bf16, b: [3H] f32 -> [M, 3H] bf16 (fused QKV matmul)."""
    M, K = x.shape
    N = w.shape[1]
    bm = _row_block(M)
    blocks = [((bm, K), x.dtype), ((K, N), w.dtype), ((1, N), jnp.float32),
              ((bm, N), x.dtype)]
    return pl.pallas_call(
        _matmul_bias_kernel,
        out_shape=jax.ShapeDtypeStruct((M, N), x.dtype),
        grid=(M // bm,),
        in_specs=[pl.BlockSpec((bm, K), lambda i: (i, 0)),
                  pl.BlockSpec((K, N), lambda i: (0, 0)),
                  pl.BlockSpec((1, N), lambda i: (0, 0))],
        out_specs=pl.BlockSpec((bm, N), lambda i: (i, 0)),
        compiler_params=_cparams(("parallel",), blocks),
    )(x, w, b.reshape(1, N))


def fused_attention(q, k, v, attention_mask):
    """q/k/v: [B, nH, S, d] bf16; attention_mask: [B, S] float -> [B, nH, S, d] bf16."""
    B, nH, S, d = q.shape
    mask3 = attention_mask.reshape(B, 1, S).astype(jnp.float32)
    blocks = [((1, 1, S, d), q.dtype)] * 3 + [((1, 1, S), jnp.float32),
                                              ((1, 1, S, d), q.dtype)]
    return pl.pallas_call(
        functools.partial(_attention_kernel, 1.0 / math.sqrt(d)),
        out_shape=jax.ShapeDtypeStruct((B, nH, S, d), q.dtype),
        grid=(B, nH),
        in_specs=[pl.BlockSpec((1, 1, S, d), lambda i, h: (i, h, 0, 0)),
                  pl.BlockSpec((1, 1, S, d), lambda i, h: (i, h, 0, 0)),
                  pl.BlockSpec((1, 1, S, d), lambda i, h: (i, h, 0, 0)),
                  pl.BlockSpec((1, 1, S), lambda i, h: (i, 0, 0))],
        out_specs=pl.BlockSpec((1, 1, S, d), lambda i, h: (i, h, 0, 0)),
        compiler_params=_cparams(("parallel", "parallel"), blocks),
    )(q, k, v, mask3)


def proj_residual_layernorm(x, w, b, residual, g, beta, eps=1e-12):
    M, K = x.shape
    N = w.shape[1]
    bm = _row_block(M)
    blocks = [((bm, K), x.dtype), ((K, N), w.dtype), ((1, N), jnp.float32),
              ((bm, N), residual.dtype), ((1, N), jnp.float32), ((1, N), jnp.float32),
              ((bm, N), x.dtype)]
    return pl.pallas_call(
        functools.partial(_proj_res_ln_kernel, eps),
        out_shape=jax.ShapeDtypeStruct((M, N), x.dtype),
        grid=(M // bm,),
        in_specs=[pl.BlockSpec((bm, K), lambda i: (i, 0)),
                  pl.BlockSpec((K, N), lambda i: (0, 0)),
                  pl.BlockSpec((1, N), lambda i: (0, 0)),
                  pl.BlockSpec((bm, N), lambda i: (i, 0)),
                  pl.BlockSpec((1, N), lambda i: (0, 0)),
                  pl.BlockSpec((1, N), lambda i: (0, 0))],
        out_specs=pl.BlockSpec((bm, N), lambda i: (i, 0)),
        compiler_params=_cparams(("parallel",), blocks),
    )(x, w, b.reshape(1, N), residual, g.reshape(1, N), beta.reshape(1, N))


def ffn_residual_layernorm(x, w1, b1, w2, b2, g, beta, eps=1e-12):
    M, H = x.shape
    F = w1.shape[1]
    bm = _row_block(M, 128)          # keep row block modest; F axis carries the weights
    bf = _lane_block(F)
    blocks = [((bm, H), x.dtype), ((H, bf), w1.dtype), ((1, bf), jnp.float32),
              ((bf, H), w2.dtype), ((1, H), jnp.float32), ((1, H), jnp.float32),
              ((1, H), jnp.float32), ((bm, H), x.dtype)]
    # TODO(synk): if DMA becomes exposed after the bf16 switch, raise pipelining
    # depth on the weight specs via pipeline_mode=pl.Buffered(3).
    return pl.pallas_call(
        functools.partial(_ffn_res_ln_kernel, eps),
        out_shape=jax.ShapeDtypeStruct((M, H), x.dtype),
        grid=(M // bm, F // bf),
        in_specs=[pl.BlockSpec((bm, H), lambda i, j: (i, 0)),
                  pl.BlockSpec((H, bf), lambda i, j: (0, j)),
                  pl.BlockSpec((1, bf), lambda i, j: (0, j)),
                  pl.BlockSpec((bf, H), lambda i, j: (j, 0)),
                  pl.BlockSpec((1, H), lambda i, j: (0, 0)),
                  pl.BlockSpec((1, H), lambda i, j: (0, 0)),
                  pl.BlockSpec((1, H), lambda i, j: (0, 0))],
        out_specs=pl.BlockSpec((bm, H), lambda i, j: (i, 0)),
        scratch_shapes=[pltpu.VMEM((bm, H), jnp.float32)],
        compiler_params=_cparams(("parallel", "arbitrary"), blocks,
                                 extra_bytes=bm * H * 4),
    )(x, w1, b1.reshape(1, F), w2, b2.reshape(1, H), g.reshape(1, H), beta.reshape(1, H))


def pool_and_classify(cls_tokens, pool_w, pool_b, cls_w_pad, cls_b_pad, num_classes):
    """tanh pooler + classifier fused; classifier pre-padded to 128 lanes at init."""
    B, H = cls_tokens.shape
    n_pad = cls_w_pad.shape[1]
    blocks = [((B, H), cls_tokens.dtype), ((H, H), pool_w.dtype), ((1, H), jnp.float32),
              ((H, n_pad), cls_w_pad.dtype), ((1, n_pad), jnp.float32),
              ((B, n_pad), jnp.float32)]
    out = pl.pallas_call(
        _pool_cls_kernel,
        out_shape=jax.ShapeDtypeStruct((B, n_pad), jnp.float32),
        grid=(1,),
        in_specs=[pl.BlockSpec((B, H), lambda i: (0, 0)),
                  pl.BlockSpec((H, H), lambda i: (0, 0)),
                  pl.BlockSpec((1, H), lambda i: (0, 0)),
                  pl.BlockSpec((H, n_pad), lambda i: (0, 0)),
                  pl.BlockSpec((1, n_pad), lambda i: (0, 0))],
        out_specs=pl.BlockSpec((B, n_pad), lambda i: (0, 0)),
        compiler_params=_cparams(("arbitrary",), blocks),
    )(cls_tokens, pool_w, pool_b.reshape(1, H), cls_w_pad, cls_b_pad)
    return out[:, :num_classes]


# ---------------------------- Parameters ----------------------------

def init_bert_classifier_params(key, cfg):
    std = 0.02
    H, F, C = cfg["hidden"], cfg["ffn"], cfg["num_classes"]
    n_rand = 5 + 4 * cfg["layers"]
    keys = iter(jax.random.split(key, n_rand))

    def w(shape):
        # matmul weights stored bf16 (MXU-native on v6e/v7x, halves DMA bytes)
        return (jax.random.normal(next(keys), shape, jnp.float32) * std).astype(jnp.bfloat16)

    n_pad = ((C + 127) // 128) * 128
    params = {
        "word_emb": w((cfg["vocab"], H)),
        "pos_emb": w((cfg["max_pos"], H)),
        "type_emb": w((cfg["type_vocab"], H)),
        "emb_ln_g": jnp.ones((H,), jnp.float32),
        "emb_ln_b": jnp.zeros((H,), jnp.float32),
        "pool_w": w((H, H)),
        "pool_b": jnp.zeros((H,), jnp.float32),
        "layers": [],
    }
    # classifier (nn.Linear(hidden, num_classes)) lane-padded ONCE at init
    cls_w_raw = jax.random.normal(next(keys), (H, C), jnp.float32) * std
    params["cls_w_pad"] = jnp.zeros((H, n_pad), jnp.float32).at[:, :C].set(
        cls_w_raw).astype(jnp.bfloat16)
    params["cls_b_pad"] = jnp.zeros((1, n_pad), jnp.float32)

    for _ in range(cfg["layers"]):
        params["layers"].append({
            # fused QKV projection weight / bias
            "wqkv": w((H, 3 * H)), "bqkv": jnp.zeros((3 * H,), jnp.float32),
            "wo": w((H, H)), "bo": jnp.zeros((H,), jnp.float32),
            "ln1_g": jnp.ones((H,), jnp.float32), "ln1_b": jnp.zeros((H,), jnp.float32),
            "w1": w((H, F)), "b1": jnp.zeros((F,), jnp.float32),
            "w2": w((F, H)), "b2": jnp.zeros((H,), jnp.float32),
            "ln2_g": jnp.ones((H,), jnp.float32), "ln2_b": jnp.zeros((H,), jnp.float32),
        })
    return params


# ---------------------------- Model (glue in plain JAX) ----------------------------

def gen_attention_mask(token_ids, valid_length):
    # Equivalent of: attention_mask[i][:v] = 1
    B, S = token_ids.shape
    return (jnp.arange(S)[None, :] < valid_length[:, None]).astype(jnp.float32)


def bert_forward(params, cfg, token_ids, segment_ids, attention_mask):
    B, S = token_ids.shape
    H, nH = cfg["hidden"], cfg["heads"]
    d = H // nH
    M = B * S

    # Word/type embedding gathers are XLA glue; positional add + LayerNorm fused in Pallas.
    wt = (jnp.take(params["word_emb"], token_ids, axis=0)
          + jnp.take(params["type_emb"], segment_ids, axis=0))          # [B, S, H] bf16
    h = embed_layernorm(wt, params["pos_emb"][:S],
                        params["emb_ln_g"], params["emb_ln_b"]).reshape(M, H)

    for layer in params["layers"]:
        x = h
        qkv = qkv_projection(x, layer["wqkv"], layer["bqkv"])           # [M, 3H]
        # layout plumbing (XLA): split fused QKV into per-head (B, nH, S, d)
        qkv_r = qkv.reshape(B, S, 3, nH, d).transpose(2, 0, 3, 1, 4)
        ctx = fused_attention(qkv_r[0], qkv_r[1], qkv_r[2], attention_mask)
        ctx = ctx.transpose(0, 2, 1, 3).reshape(M, H)
        h1 = proj_residual_layernorm(ctx, layer["wo"], layer["bo"],
                                     x, layer["ln1_g"], layer["ln1_b"])
        h = ffn_residual_layernorm(h1, layer["w1"], layer["b1"],
                                   layer["w2"], layer["b2"],
                                   layer["ln2_g"], layer["ln2_b"])

    seq_out = h.reshape(B, S, H)
    cls = seq_out[:, 0, :]
    return seq_out, cls


def bert_classifier_forward(params, cfg, token_ids, valid_length, segment_ids,
                            dr_rate=None):
    """Mirror of BERTClassifier.forward (pooler + classifier fused into one kernel)."""
    attention_mask = gen_attention_mask(token_ids, valid_length)
    _, cls = bert_forward(params, cfg, token_ids,
                          segment_ids.astype(jnp.int32), attention_mask)
    # TODO(synk): dr_rate (nn.Dropout) is identity at inference; not implemented.
    return pool_and_classify(cls, params["pool_w"], params["pool_b"],
                             params["cls_w_pad"], params["cls_b_pad"],
                             cfg["num_classes"])


# ---------------------------- Main ----------------------------

if __name__ == "__main__":
    cfg = dict(vocab=100, hidden=32, heads=2, ffn=64, layers=2,
               max_pos=16, type_vocab=2, num_classes=2)

    key = jax.random.PRNGKey(0)
    pkey, dkey = jax.random.split(key)
    params = init_bert_classifier_params(pkey, cfg)

    B, S = 2, 8
    token_ids = jax.random.randint(dkey, (B, S), 0, cfg["vocab"], dtype=jnp.int32)
    valid_length = jnp.array([5, 8], dtype=jnp.int32)
    segment_ids = jnp.zeros((B, S), dtype=jnp.int32)

    logits = bert_classifier_forward(params, cfg, token_ids, valid_length, segment_ids)
    logits = jax.block_until_ready(logits)
    assert logits.shape == (B, cfg["num_classes"])
    assert bool(jnp.all(jnp.isfinite(logits)))
    print("KERNEL_OK")
</pallas_src>

<mosaic_0001>
module attributes {stable_mosaic.version = 11 : i64} {
  func.func @_embed_ln_kernel(%arg0: i32, %arg1: i32, %arg2: memref<1x8x32xbf16, #tpu.memory_space<vmem>>, %arg3: memref<8x32xbf16, #tpu.memory_space<vmem>>, %arg4: memref<1x32xf32, #tpu.memory_space<vmem>>, %arg5: memref<1x32xf32, #tpu.memory_space<vmem>>, %arg6: memref<1x8x32xbf16, #tpu.memory_space<vmem>>) attributes {dimension_semantics = [#tpu.dimension_semantics<parallel>, #tpu.dimension_semantics<parallel>], iteration_bounds = array<i64: 2, 1>, scalar_prefetch = 0 : i64, scratch_operands = 0 : i64, tpu.core_type = #tpu.core_type<tc>, window_params = [{transform_indices = @transform_0, window_bounds = array<i64: 1, 8, 32>}, {transform_indices = @transform_1, window_bounds = array<i64: 8, 32>}, {pipeline_mode = #tpu.pipeline_mode<synchronous>, transform_indices = @transform_2, window_bounds = array<i64: 1, 32>}, {pipeline_mode = #tpu.pipeline_mode<synchronous>, transform_indices = @transform_3, window_bounds = array<i64: 1, 32>}, {transform_indices = @transform_4, window_bounds = array<i64: 1, 8, 32>}]} {
    %c0 = arith.constant 0 : index
    %c0_0 = arith.constant 0 : index
    %c0_1 = arith.constant 0 : index
    %0 = vector.load %arg2[%c0, %c0_0, %c0_1] : memref<1x8x32xbf16, #tpu.memory_space<vmem>>, vector<1x8x32xbf16>
    %1 = vector.shape_cast %0 : vector<1x8x32xbf16> to vector<8x32xbf16>
    %2 = arith.extf %1 : vector<8x32xbf16> to vector<8x32xf32>
    %c0_2 = arith.constant 0 : index
    %c0_3 = arith.constant 0 : index
    %3 = vector.load %arg3[%c0_2, %c0_3] : memref<8x32xbf16, #tpu.memory_space<vmem>>, vector<8x32xbf16>
    %4 = arith.extf %3 : vector<8x32xbf16> to vector<8x32xf32>
    %5 = arith.addf %2, %4 : vector<8x32xf32>
    %c0_4 = arith.constant 0 : index
    %c0_5 = arith.constant 0 : index
    %6 = vector.load %arg4[%c0_4, %c0_5] : memref<1x32xf32, #tpu.memory_space<vmem>>, vector<1x32xf32>
    %c0_6 = arith.constant 0 : index
    %c0_7 = arith.constant 0 : index
    %7 = vector.load %arg5[%c0_6, %c0_7] : memref<1x32xf32, #tpu.memory_space<vmem>>, vector<1x32xf32>
    %cst = arith.constant dense<0.000000e+00> : vector<8xf32>
    %8 = vector.multi_reduction <add>, %5, %cst [1] : vector<8x32xf32> to vector<8xf32>
    %9 = vector.shape_cast %8 : vector<8xf32> to vector<8x1xf32>
    %cst_8 = arith.constant 3.200000e+01 : f32
    %10 = vector.broadcast %cst_8 : f32 to vector<8x1xf32>
    %11 = arith.divf %9, %10 : vector<8x1xf32>
    %12 = vector.broadcast %11 : vector<8x1xf32> to vector<8x32xf32>
    %13 = arith.subf %5, %12 : vector<8x32xf32>
    %14 = arith.mulf %13, %13 : vector<8x32xf32>
    %cst_9 = arith.constant dense<0.000000e+00> : vector<8xf32>
    %15 = vector.multi_reduction <add>, %14, %cst_9 [1] : vector<8x32xf32> to vector<8xf32>
    %16 = vector.shape_cast %15 : vector<8xf32> to vector<8x1xf32>
    %cst_10 = arith.constant 3.200000e+01 : f32
    %17 = vector.broadcast %cst_10 : f32 to vector<8x1xf32>
    %18 = arith.divf %16, %17 : vector<8x1xf32>
    %19 = vector.broadcast %11 : vector<8x1xf32> to vector<8x32xf32>
    %20 = arith.subf %5, %19 : vector<8x32xf32>
    %cst_11 = arith.constant 9.99999996E-13 : f32
    %21 = vector.broadcast %cst_11 : f32 to vector<8x1xf32>
    %22 = arith.addf %18, %21 : vector<8x1xf32>
    %23 = math.rsqrt %22 : vector<8x1xf32>
    %24 = vector.broadcast %23 : vector<8x1xf32> to vector<8x32xf32>
    %25 = arith.mulf %20, %24 : vector<8x32xf32>
    %26 = vector.broadcast %6 : vector<1x32xf32> to vector<8x32xf32>
    %27 = arith.mulf %25, %26 : vector<8x32xf32>
    %28 = vector.broadcast %7 : vector<1x32xf32> to vector<8x32xf32>
    %29 = arith.addf %27, %28 : vector<8x32xf32>
    %30 = arith.truncf %29 : vector<8x32xf32> to vector<8x32xbf16>
    %c0_12 = arith.constant 0 : index
    %c0_13 = arith.constant 0 : index
    %c0_14 = arith.constant 0 : index
    %31 = vector.load %arg6[%c0_12, %c0_13, %c0_14] : memref<1x8x32xbf16, #tpu.memory_space<vmem>>, vector<1x8x32xbf16>
    %32 = vector.shape_cast %31 : vector<1x8x32xbf16> to vector<8x32xbf16>
    %33 = vector.shape_cast %30 : vector<8x32xbf16> to vector<1x8x32xbf16>
    tpu.vector_store %arg6[%c0_12, %c0_13, %c0_14], %33 {strides = array<i32>} : memref<1x8x32xbf16, #tpu.memory_space<vmem>>, vector<1x8x32xbf16>,
    return
  }
  func.func @transform_0(%arg0: i32, %arg1: i32) -> (i32, i32, i32) {
    %c0_i32 = arith.constant 0 : i32
    %c0_i32_0 = arith.constant 0 : i32
    return %arg0, %arg1, %c0_i32 : i32, i32, i32
  }
  func.func @transform_1(%arg0: i32, %arg1: i32) -> (i32, i32) {
    %c0_i32 = arith.constant 0 : i32
    %c0_i32_0 = arith.constant 0 : i32
    return %arg1, %c0_i32 : i32, i32
  }
  func.func @transform_2(%arg0: i32, %arg1: i32) -> (i32, i32) {
    %c0_i32 = arith.constant 0 : i32
    %c0_i32_0 = arith.constant 0 : i32
    %c0_i32_1 = arith.constant 0 : i32
    return %c0_i32, %c0_i32_0 : i32, i32
  }
  func.func @transform_3(%arg0: i32, %arg1: i32) -> (i32, i32) {
    %c0_i32 = arith.constant 0 : i32
    %c0_i32_0 = arith.constant 0 : i32
    %c0_i32_1 = arith.constant 0 : i32
    return %c0_i32, %c0_i32_0 : i32, i32
  }
  func.func @transform_4(%arg0: i32, %arg1: i32) -> (i32, i32, i32) {
    %c0_i32 = arith.constant 0 : i32
    %c0_i32_0 = arith.constant 0 : i32
    return %arg0, %arg1, %c0_i32 : i32, i32, i32
  }
}

</mosaic_0001>

<bundles_post_ra>
// kernel: tpu_custom_call.1
= control target key start
LH: loop header
LB: loop body
LE: loop exit
PB: predicated region body
PF: predicated region fallthrough
CT: control target
= control target key end

     0   :  { %9 = vsyncpa [#allocation3], 0  ;;  %s888_s0 = inlined_call_operand.hbm [shape: bf16[2,8,32], index: 0, kind: input, shape index: {}]   ;;  %s889_s1 = inlined_call_operand.hbm [shape: bf16[8,32], index: 1, kind: input, shape index: {}]   ;;  %s890_s2 = inlined_call_operand.vmem [shape: f32[1,32], index: 2, kind: input, shape index: {}]   ;;  %s891_s3 = inlined_call_operand.vmem [shape: f32[1,32], index: 3, kind: input, shape index: {}]   ;;  %s892_s4 = inlined_call_operand.hbm [shape: bf16[2,8,32], index: 4, kind: output, shape index: {}]  }
   0x1   :  { %11 = vsyncpa [#allocation3 + $0x1], 0 }
   0x2   :  { %12 = vsyncpa [#allocation6], 0 }
   0x3   :  { %13 = vsyncpa [#allocation4], 0 }
   0x4   :  { %15 = vsyncpa [#allocation4 + $0x1], 0  ;;  %s662_s15 = smov 0   ;;  %s664_s16 = smov 0  }
   0x5   :  { %s666_s17 = smov 0   ;;  %s668_s18 = smov 0  }
   0x6   :  { %s670_s19 = smov 0   ;;  %s672_s20 = smov 0  }
   0x7 LB: > { %s396_s21 = sadd.s32 4294967295, %s632_s20   ;;  %s397_s22 = sadd.s32 4294967294, %s632_s20   ;;  %s632_s20 = sphi %s672_s20, %s21_s20   ;;  %s628_s19 = sphi %s670_s19, %s917_s19   ;;  %s624_s18 = sphi %s668_s18, %s916_s18   ;;  %s620_s17 = sphi %s666_s17, %s915_s17   ;;  %s616_s16 = sphi %s664_s16, %s914_s16   ;;  %s612_s15 = sphi %s662_s15, %s913_s15  }
   0x8   : > { %p55_p0 = scmp.ne.s32.totalorder %s616_s16, %s612_s15  ;;  %p696_p1 = scmp.eq.s32.totalorder %s396_s21, 0 }
   0x9   : > { %p700_p2 = scmp.eq.s32.totalorder %s396_s21, 1  ;;  %p155_p3 = scmp.eq.s32.totalorder %s397_s22, 1 }
   0xa   : > { %s897_s23 = scalar_select %p696_p1, 1, 0 }
   0xb   : > { %s898_s24 = scalar_select %p700_p2, 1, 0 }
   0xc   : > { %p706_p4 = por %p696_p1, %p55_p0  ;;  %p398_p5 = scmp.ge.s32.totalorder %s632_s20, 1 }
   0xd   : > { %p711_p6 = por %p155_p3, %p55_p0  ;;  %p162_p7 = scmp.lt.s32.totalorder %s632_s20, 3 }
   0xe   : > { %s899_s25 = scalar_select %p706_p4, 1, 0 }
   0xf   : > { %s900_s26 = scalar_select %p711_p6, 1, 0 }
  0x10   : > { %p716_p8 = pnand %p398_p5, %p162_p7  ;;  %s634_s28 = smov [#allocation5]  }
  0x11   : > { %s177_s29 = sshll.u32 %s634_s28, 4  ;;  %s33_s5 = sadd.s32 1, %s628_s19  ;;  %s178_s29 = int_to_ptr.vmem [resolvable:$true] %s177_s29 }
  0x12   : > { %s901_s27 = scalar_select %p716_p8, 1, 0 }
  0x13   : > { %p421_p10 = pneg %p716_p8  ;;  %s42_s6 = sadd.s32 1, %s620_s17 }
  0x14   : > { %p731_p12 = scmp.ge.s32.totalorder %s33_s5, 2  ;;  %s488_s10 = scalar_lea.hbm %s889_s1, 64 }
  0x15   : > { %p725_p11 = pnand %p421_p10, %p696_p1  ;;  %p489_p13 = scmp.ne.s32.totalorder %s889_s1, %s488_s10 }
  0x16   : > { %s903_s7 = scalar_select %p731_p12, 1, 0 }
  0x17   : > { %p490_p0 = pneg %p725_p11  ;;  %p495_p7 = scmp.lt.u32.totalorder %s488_s10, %s889_s1 }
  0x19   : > { %p491_p3 = pnand %p490_p0, %p489_p13 }
  0x1b   : > { %p492_p5 = pneg %p491_p3 }
  0x1d   : > { %p497_p10 = pnand %p495_p7, %p492_p5 }
  0x1f   : > { %500 = shalt.err (!%p497_p10)
}
  0x20   : > { %s501_s21 = scalar_lea.vmem %s178_s29, 64  ;;  %p509_p4 = scmp.lt.s32.totalorder %s178_s29, %s178_s29 }
  0x21   : > { %p502_p9 = scmp.ne.s32.totalorder %s178_s29, %s501_s21  ;;  %p510_p8 = scmp.lt.s32.totalorder %s501_s21, %s501_s21 }
  0x23   : > { %p504_p6 = pnand %p502_p9, %p490_p0  ;;  %p511_p2 = por %p510_p8, %p509_p4 }
  0x25   : > { %p505_p1 = pneg %p504_p6 }
  0x27   : > { %p512_p12 = pnand %p511_p2, %p505_p1 }
  0x29   : > { %515 = shalt.err (!%p512_p12)
}
  0x2a   : > { %424 = dma.hbm_to_vmem [thread:$0]  (!%p725_p11), %s889_s1, 64, %s178_s29, [#allocation6]  }
  0x2b   : > { %p904_p4 = scmp.ne.s32.totalorder %s903_s7, 0  ;;  %p49_p1 = scmp.ne.s32.totalorder %s620_s17, %s616_s16 }
  0x2c   : > { %p50_p2 = scmp.eq.s32.totalorder %s632_s20, 0  ;;  %p434_p6 = scmp.lt.s32.totalorder %s632_s20, 2 }
  0x2d   : > { %s919_s5 = smov (%p904_p4, %s33_s5), 0  ;;  %p905_p12 = scmp.ne.s32.totalorder %s898_s24, 0 }
  0x2e   : > { %s37_s30 = ssub.s32 %s628_s19, %s919_s5  ;;  %p51_p9 = por %p50_p2, %p49_p1 }
  0x2f   : > { %p40_p8 = scmp.eq.s32.totalorder %s37_s30, 0  ;;  %p763_p13 = por %p905_p12, %p49_p1 }
  0x30   : > { %s194_s9 = sand.u32 1, %s620_s17   ;;  %s402_s7 = sshll.u32 %s628_s19, 6 }
  0x31   : > { %s771_s10 = scalar_select %p40_p8, %s620_s17, %s42_s6  }
  0x32   : > { %s401_s29 = sshll.u32 %s194_s9, 2  ;;  %s777_s13 = scalar_lea.hbm %s888_s0, %s402_s7 }
  0x33   : > { %s198_s24 = scalar_lea.vmem [#allocation2], %s401_s29  ;;  %p781_p11 = pnand %p434_p6, %p51_p9 }
  0x34   : > { %s206_s14 = sshll.u32 %s198_s24, 4  ;;  %s195_s6 = scalar_lea.sflag [#allocation3], %s194_s9  ;;  %s779_s14 = int_to_ptr.vmem [resolvable:$true] %s206_s14 }
  0x35   : > { %s516_s22 = scalar_lea.hbm %s777_s13, 64  ;;  %p518_p3 = pneg %p781_p11 }
  0x36   : > { %p517_p0 = scmp.ne.s32.totalorder %s777_s13, %s516_s22  ;;  %s521_s29 = scalar_lea.hbm %s888_s0, 128 }
  0x37   : > { %p522_p10 = scmp.lt.u32.totalorder %s777_s13, %s888_s0  ;;  %p523_p4 = scmp.lt.u32.totalorder %s521_s29, %s516_s22 }
  0x38   : > { %p519_p5 = pnand %p518_p3, %p517_p0  ;;  %p525_p2 = scmp.lt.u32.totalorder %s516_s22, %s777_s13 }
  0x39   : > { %p524_p1 = por %p523_p4, %p522_p10 }
  0x3a   : > { %p520_p7 = pneg %p519_p5 }
  0x3b   : > { %p526_p6 = por %p525_p2, %p524_p1 }
  0x3d   : > { %p527_p8 = pnand %p526_p6, %p520_p7 }
  0x3f   : > { %530 = shalt.err (!%p527_p8)
}
  0x40   : > { %s531_s9 = scalar_lea.vmem %s779_s14, 64  ;;  %s635_s12 = smov [#allocation2]  }
  0x41   : > { %p532_p9 = scmp.ne.s32.totalorder %s779_s14, %s531_s9  ;;  %s536_s24 = sshll.u32 %s635_s12, 4  ;;  %s537_s24 = int_to_ptr.vmem [resolvable:$false] %s536_s24 }
  0x42   : > { %s538_s28 = scalar_lea.vmem %s537_s24, 128  ;;  %p539_p5 = scmp.lt.s32.totalorder %s779_s14, %s537_s24 }
  0x43   : > { %p534_p12 = pnand %p532_p9, %p518_p3  ;;  %p540_p10 = scmp.lt.s32.totalorder %s538_s28, %s531_s9 }
  0x45   : > { %p535_p0 = pneg %p534_p12  ;;  %p541_p4 = por %p540_p10, %p539_p5 }
  0x47   : > { %p542_p1 = pnand %p541_p4, %p535_p0 }
  0x49   : > { %545 = shalt.err (!%p542_p1)
}
  0x4a   : > { %428 = dma.hbm_to_vmem [thread:$0]  (!%p781_p11), %s777_s13, 64, %s779_s14, %s195_s6  }
  0x4b   : > { %p908_p7 = scmp.ne.s32.totalorder %s901_s27, 0 }
  0x4c   : > { %s813_s22 = sand.u32 (!%p908_p7), 1, %s616_s16   ;;  %p909_p3 = scmp.ne.s32.totalorder (!%p908_p7), %s899_s25, 0 }
  0x4d   : > { %215 = sbr.rel (%p908_p7) target bundleno = 422 (0x1a6), region = 36  ;;  %s404_s30 = sshll.u32 (!%p908_p7), %s813_s22, 2 }
  0x4e   : > { %s218_s29 = scalar_lea.sflag (!%p908_p7), [#allocation3], %s813_s22  ;;  %s221_s7 = scalar_lea.vmem (!%p908_p7), [#allocation2], %s404_s30 }
  0x54   : > { %599 = dma.done.wait (%p909_p3), %s218_s29, 64  }
  0x55   : > { %601 = vsyncadd (%p909_p3), %s218_s29, 4294967232  ;;  %p910_p11 = scmp.ne.s32.totalorder %s897_s23, 0 }
  0x57   : > { %603 = dma.done.wait (%p910_p11), [#allocation6], 64  }
  0x58   : > { %605 = vsyncadd (%p910_p11), [#allocation6], 4294967232  ;;  %v250_v0 = vld [vmem:[%s221_s7] sm:$0xf]  ;;  %v252_v1 = vld [vmem:[#allocation5] sm:$0xf] }
  0x59   : > { %v251_v2 = vunpack.c.l.bf16 %v250_v0  ;;  %v253_v3 = vunpack.c.l.bf16 %v252_v1  ;;  %vm257_vm0 = vcmask 261120   ;;  %v407_v15 = vld [vmem:[%s890_s2] ss:$0 sm:$0xff]  ;;  %s410_s14 = sshll.u32 %s624_s18, 6  ;;  %s249_s21 = scalar_lea.vmem [#allocation7], %s404_s30  ;;  %vm287_vm1 = vcmask 257024  }
  0x5a   : > { %v408_v17 = vld [vmem:[%s891_s3] ss:$0 sm:$0xff]  ;;  %s304_s6 = sshll.u32 %s249_s21, 4  ;;  %s839_s12 = scalar_lea.hbm %s892_s4, %s410_s14  ;;  %s841_s6 = int_to_ptr.vmem [resolvable:$true] %s304_s6 }
  0x5b   : > { %v254_v4 = vadd.f32 %v253_v3, %v251_v2  ;;  %s290_s24 = scalar_lea.sflag [#allocation4], %s813_s22  ;;  %s546_s28 = scalar_lea.vmem %s841_s6, 64 }
  0x5c   : > { %p547_p2 = scmp.ne.s32.totalorder %s841_s6, %s546_s28  ;;  %s636_s18 = smov [#allocation7]  }
  0x5d   : > { %v258_v5 = vsel %vm257_vm0, %v254_v4, 0.0  ;;  %s550_s30 = sshll.u32 %s636_s18, 4  ;;  %s551_s30 = int_to_ptr.vmem [resolvable:$false] %s550_s30 }
  0x5e   : > { %259 = vadd.xlane.f32.xlu0 %v258_v5  ;;  %p548_p6 = pnand %p547_p2, %p763_p13  ;;  %s552_s29 = scalar_lea.vmem %s551_s30, 128 }
  0x5f   : > { %p553_p9 = scmp.lt.s32.totalorder %s841_s6, %s551_s30  ;;  %p554_p12 = scmp.lt.s32.totalorder %s552_s29, %s546_s28 }
  0x60   : > { %p549_p8 = pneg %p548_p6 }
  0x61   : > { %p555_p0 = por %p554_p12, %p553_p9 }
  0x63   : > { %p556_p5 = pnand %p555_p0, %p549_p8 }
  0xeb   : > { %v260_v6 = vpop.xlane.xlu0 %259 }
  0xec   : > { %v262_v7 = vmul.f32 0.03125, %v260_v6 }
  0xee   : > { %v263_v8 = vsub.f32 %v254_v4, %v262_v7 }
  0xf0   : > { %v264_v9 = vmul.f32 %v263_v8, %v263_v8 }
  0xf2   : > { %v265_v10 = vsel %vm257_vm0, %v264_v9, 0.0 }
  0xf3   : > { %266 = vadd.xlane.f32.xlu0 %v265_v10 }
 0x180   : > { %v267_v11 = vpop.xlane.xlu0 %266 }
 0x181   : > { %v268_v12 = vmul.f32 0.03125, %v267_v11 }
 0x183   : > { %v269_v13 = vadd.f32 1e-12, %v268_v12 }
 0x185   : > { %486 = vrsqrt.f32 %v269_v13 }
 0x18f   : > { %v487_v14 = vpop.eup %486 }
 0x190   : > { %v271_v16 = vmul.f32 %v487_v14, %v263_v8 }
 0x192   : > { %v278_v18 = vmul.f32 %v407_v15, %v271_v16 }
 0x194   : > { %v285_v19 = vadd.f32 %v408_v17, %v278_v18 }
 0x196   : > { %v286_v20 = vpack.c.bf16 %v285_v19, %v285_v19 }
 0x198   : > { %288 = vst.msk [vmem:[%s249_s21] sm:$0xf] %vm287_vm1, %v286_v20 }
 0x199   : > { %559 = shalt.err (!%p556_p5)
}
 0x19a   : > { %s560_s22 = scalar_lea.hbm %s839_s12, 64  ;;  %s564_s25 = scalar_lea.hbm %s892_s4, 128 }
 0x19b   : > { %p561_p10 = scmp.ne.s32.totalorder %s839_s12, %s560_s22  ;;  %p565_p7 = scmp.lt.u32.totalorder %s839_s12, %s892_s4 }
 0x19c   : > { %p566_p3 = scmp.lt.u32.totalorder %s564_s25, %s560_s22  ;;  %p568_p2 = scmp.lt.u32.totalorder %s560_s22, %s839_s12 }
 0x19d   : > { %p562_p4 = pnand %p561_p10, %p763_p13 }
 0x19e   : > { %p567_p11 = por %p566_p3, %p565_p7 }
 0x19f   : > { %p563_p1 = pneg %p562_p4 }
 0x1a0   : > { %p569_p6 = por %p568_p2, %p567_p11 }
 0x1a2   : > { %p570_p8 = pnand %p569_p6, %p563_p1 }
 0x1a4   : > { %573 = shalt.err (!%p570_p8)
}
 0x1a5   : > { %419 = dma.vmem_to_hbm [thread:$0]  (%p763_p13), %s841_s6, 64, %s839_s12, %s290_s24  }
 0x1a6 PF: > { %s316_s14 = sand.u32 1, %s612_s15   ;;  %p911_p9 = scmp.ne.s32.totalorder %s900_s26, 0 }
 0x1a7   : > { %p912_p12 = scmp.ge.s32.totalorder %s632_s20, 2  ;;  %s317_s21 = scalar_lea.sflag [#allocation4], %s316_s14 }
 0x1a9   : > { %p430_p0 = pnand %p912_p12, %p911_p9 }
 0x1ab   : > { %607 = dma.done.wait (!%p430_p0), %s317_s21, 64  }
 0x1ac   : > { %609 = vsyncadd (!%p430_p0), %s317_s21, 4294967232  ;;  %s21_s20 = sadd.s32 1, %s632_s20   ;;  %s913_s15 = smov %s616_s16 }
 0x1ad   : > { %p18_p5 = scmp.ge.s32.totalorder %s21_s20, 4   ;;  %s914_s16 = smov %s620_s17 }
 0x1ae   : > { %s915_s17 = smov %s771_s10  ;;  %s916_s18 = smov %s628_s19 }
 0x1af   : > { %s917_s19 = smov %s919_s5  ;;  %20 = sbr.rel (!%p18_p5) target bundleno = 7 (0x7), region = 86 }
 0x1b6   :  { %322 = vsyncpa [#allocation3], 1 }
 0x1b7   :  { %324 = vsyncpa [#allocation3 + $0x1], 1 }
 0x1b8   :  { %325 = vsyncpa [#allocation6], 1 }
 0x1b9   :  { %326 = vsyncpa [#allocation4], 1 }
 0x1ba   :  { %328 = vsyncpa [#allocation4 + $0x1], 1 }

</bundles_post_ra>
